<compile_context>
chip_gen: v6e
topology: v6e:2x2x1
jax: 0.10.0
libtpu: 0.0.40
codegen_flags: <defaults>
</compile_context>

<pallas_src>
import jax
import jax.numpy as jnp
from jax.experimental import pallas as pl
from jax.experimental.pallas import tpu as pltpu

NEG_SLOPE = 0.01      # PyTorch nn.LeakyReLU default negative_slope
OUT_PAD = 128         # lane-dense output width


def _round_up(x, m):
    return ((x + m - 1) // m) * m


def _leaky_relu(x):
    return jnp.where(x > 0, x, NEG_SLOPE * x)


def mlp_kernel(x_ref,
               w1_ref, b1_ref, w2_ref, b2_ref, w3_ref, b3_ref,
               w4_ref, b4_ref, w5_ref, b5_ref, w6_ref, b6_ref,
               o_ref):
    # Layer 1 may be bf16 (x, W1); preferred_element_type keeps the accumulate f32.
    h = x_ref[...]
    for w_ref, b_ref in ((w1_ref, b1_ref), (w2_ref, b2_ref), (w3_ref, b3_ref),
                         (w4_ref, b4_ref), (w5_ref, b5_ref), (w6_ref, b6_ref)):
        h = jnp.dot(h, w_ref[...], preferred_element_type=jnp.float32)
        h = h + b_ref[...]          # b is (1, out) -> broadcasts over batch rows
        h = _leaky_relu(h)          # module applies LeakyReLU after fc6 too
    o_ref[...] = h.astype(o_ref.dtype)


def classification_head2(x, params, *, use_bf16_layer1=False, tm=None):
    """x: (B, input_dim). params: list of (W, b), W:(in,out), b:(1,out)."""
    B, D = x.shape
    num_classes = params[-1][0].shape[1]

    # --- pad final layer to 128 output lanes (zeros) for unmasked stores ----
    w6, b6 = params[-1]
    w6p = jnp.zeros((w6.shape[0], OUT_PAD), w6.dtype).at[:, :num_classes].set(w6)
    b6p = jnp.zeros((1, OUT_PAD), b6.dtype).at[:, :num_classes].set(b6)
    layer_params = list(params[:-1]) + [(w6p, b6p)]

    # --- optional bf16 on the streaming layer-1 operands --------------------
    if use_bf16_layer1:
        x_in = x.astype(jnp.bfloat16)
        w1, b1 = layer_params[0]
        layer_params[0] = (w1.astype(jnp.bfloat16), b1)
    else:
        x_in = x

    # --- batch tile: sublane-packed multiple, capped for the smallest VMEM --
    sub = 16 if use_bf16_layer1 else 8
    cap = 1024 if use_bf16_layer1 else 512          # safe on v5e/v6e/v7x
    if tm is None:
        tm = min(cap, _round_up(B, sub))
    tm = max(sub, _round_up(tm, sub))

    # pad batch to a multiple of tm -> no ragged last tile / masked loads
    Bp = _round_up(B, tm)
    if Bp != B:
        x_in = jnp.pad(x_in, ((0, Bp - B), (0, 0)))
    grid = (Bp // tm,)

    # --- specs: x/out stream per tile, weights resident (constant block) ----
    flat = [x_in]
    in_specs = [pl.BlockSpec((tm, D), lambda i: (i, 0))]
    for w, b in layer_params:
        flat += [w, b]
        in_specs.append(pl.BlockSpec(w.shape, lambda i: (0, 0)))
        in_specs.append(pl.BlockSpec(b.shape, lambda i: (0, 0)))
    out_spec = pl.BlockSpec((tm, OUT_PAD), lambda i: (i, 0))

    # --- VMEM budget: 2x buffered x & out tiles + resident weights + slack --
    x_bytes = tm * D * x_in.dtype.itemsize
    out_bytes = tm * OUT_PAD * 4
    w_bytes = sum(w.size * w.dtype.itemsize + b.size * b.dtype.itemsize
                  for w, b in layer_params)
    vmem_limit = int(2 * (x_bytes + out_bytes) + w_bytes + (4 << 20))
    vmem_limit = min(max(vmem_limit, 32 << 20), 60 << 20)   # <= v7x 64 MiB/TC

    out = pl.pallas_call(
        mlp_kernel,
        out_shape=jax.ShapeDtypeStruct((Bp, OUT_PAD), jnp.float32),
        grid=grid,
        in_specs=in_specs,
        out_specs=out_spec,
        compiler_params=pltpu.CompilerParams(
            dimension_semantics=("parallel",),      # megacore on v7x
            vmem_limit_bytes=vmem_limit),
    )(*flat)
    return out[:B, :num_classes]


def init_params(key, input_dim=5120, num_classes=3):
    """Deterministic init matching nn.Linear shapes (uniform +-1/sqrt(fan_in))."""
    dims = [input_dim, 64, 32, 16, 8, 4, num_classes]
    params = []
    for i in range(len(dims) - 1):
        fan_in, fan_out = dims[i], dims[i + 1]
        key, kw, kb = jax.random.split(key, 3)
        bound = 1.0 / jnp.sqrt(jnp.float32(fan_in))
        w = jax.random.uniform(kw, (fan_in, fan_out), jnp.float32, -bound, bound)
        b = jax.random.uniform(kb, (1, fan_out), jnp.float32, -bound, bound)
        params.append((w, b))
    return params


def reference_forward(x, params):
    h = x
    for w, b in params:
        h = _leaky_relu(h @ w + b)     # LeakyReLU after every layer, incl. fc6
    return h


if __name__ == "__main__":
    key = jax.random.PRNGKey(0)
    B, INPUT_DIM, NUM_CLASSES = 8, 512, 3   # small shapes consistent with the module

    kx, kp = jax.random.split(key)
    x = jax.random.normal(kx, (B, INPUT_DIM), jnp.float32)
    params = init_params(kp, input_dim=INPUT_DIM, num_classes=NUM_CLASSES)
    ref = reference_forward(x, params)

    # 1) f32 path, single tile
    out = jax.block_until_ready(classification_head2(x, params))
    assert out.shape == (B, NUM_CLASSES)
    assert jnp.allclose(out, ref, atol=1e-5, rtol=1e-5), "f32 mismatch vs reference"

    # 2) f32 path, multi-step grid with batch padding (B=20 not a tile multiple)
    B2 = 20
    x2 = jax.random.normal(jax.random.PRNGKey(1), (B2, INPUT_DIM), jnp.float32)
    ref2 = reference_forward(x2, params)
    out2 = jax.block_until_ready(classification_head2(x2, params, tm=8))
    assert out2.shape == (B2, NUM_CLASSES)
    assert jnp.allclose(out2, ref2, atol=1e-5, rtol=1e-5), "gridded mismatch"

    # 3) bf16 layer-1 path (bandwidth-optimized), loose tolerance
    out_bf16 = jax.block_until_ready(
        classification_head2(x, params, use_bf16_layer1=True))
    assert out_bf16.shape == (B, NUM_CLASSES)
    assert jnp.allclose(out_bf16, ref, atol=2e-2, rtol=2e-2), "bf16 mismatch"

    print("KERNEL_OK")
</pallas_src>

<mosaic_0001>
module attributes {stable_mosaic.version = 11 : i64} {
  func.func @mlp_kernel(%arg0: i32, %arg1: memref<8x512xf32, #tpu.memory_space<vmem>>, %arg2: memref<512x64xf32, #tpu.memory_space<vmem>>, %arg3: memref<1x64xf32, #tpu.memory_space<vmem>>, %arg4: memref<64x32xf32, #tpu.memory_space<vmem>>, %arg5: memref<1x32xf32, #tpu.memory_space<vmem>>, %arg6: memref<32x16xf32, #tpu.memory_space<vmem>>, %arg7: memref<1x16xf32, #tpu.memory_space<vmem>>, %arg8: memref<16x8xf32, #tpu.memory_space<vmem>>, %arg9: memref<1x8xf32, #tpu.memory_space<vmem>>, %arg10: memref<8x4xf32, #tpu.memory_space<vmem>>, %arg11: memref<1x4xf32, #tpu.memory_space<vmem>>, %arg12: memref<4x128xf32, #tpu.memory_space<vmem>>, %arg13: memref<1x128xf32, #tpu.memory_space<vmem>>, %arg14: memref<8x128xf32, #tpu.memory_space<vmem>>) attributes {dimension_semantics = [#tpu.dimension_semantics<parallel>], iteration_bounds = array<i64: 1>, scalar_prefetch = 0 : i64, scratch_operands = 0 : i64, tpu.core_type = #tpu.core_type<tc>, window_params = [{transform_indices = @transform_0, window_bounds = array<i64: 8, 512>}, {pipeline_mode = #tpu.pipeline_mode<synchronous>, transform_indices = @transform_1, window_bounds = array<i64: 512, 64>}, {pipeline_mode = #tpu.pipeline_mode<synchronous>, transform_indices = @transform_2, window_bounds = array<i64: 1, 64>}, {pipeline_mode = #tpu.pipeline_mode<synchronous>, transform_indices = @transform_3, window_bounds = array<i64: 64, 32>}, {pipeline_mode = #tpu.pipeline_mode<synchronous>, transform_indices = @transform_4, window_bounds = array<i64: 1, 32>}, {pipeline_mode = #tpu.pipeline_mode<synchronous>, transform_indices = @transform_5, window_bounds = array<i64: 32, 16>}, {pipeline_mode = #tpu.pipeline_mode<synchronous>, transform_indices = @transform_6, window_bounds = array<i64: 1, 16>}, {pipeline_mode = #tpu.pipeline_mode<synchronous>, transform_indices = @transform_7, window_bounds = array<i64: 16, 8>}, {pipeline_mode = #tpu.pipeline_mode<synchronous>, transform_indices = @transform_8, window_bounds = array<i64: 1, 8>}, {pipeline_mode = #tpu.pipeline_mode<synchronous>, transform_indices = @transform_9, window_bounds = array<i64: 8, 4>}, {pipeline_mode = #tpu.pipeline_mode<synchronous>, transform_indices = @transform_10, window_bounds = array<i64: 1, 4>}, {pipeline_mode = #tpu.pipeline_mode<synchronous>, transform_indices = @transform_11, window_bounds = array<i64: 4, 128>}, {pipeline_mode = #tpu.pipeline_mode<synchronous>, transform_indices = @transform_12, window_bounds = array<i64: 1, 128>}, {transform_indices = @transform_13, window_bounds = array<i64: 8, 128>}]} {
    %c0 = arith.constant 0 : index
    %c0_0 = arith.constant 0 : index
    %0 = vector.load %arg1[%c0, %c0_0] : memref<8x512xf32, #tpu.memory_space<vmem>>, vector<8x512xf32>
    %c0_1 = arith.constant 0 : index
    %c0_2 = arith.constant 0 : index
    %1 = vector.load %arg2[%c0_1, %c0_2] : memref<512x64xf32, #tpu.memory_space<vmem>>, vector<512x64xf32>
    %cst = arith.constant dense<0.000000e+00> : vector<8x64xf32>
    %2 = tpu.matmul %0, %1, %cst {dimension_numbers = #tpu.dot_dimension_numbers<[1], [0], [0], [1], [0, 0, 1, 1], [], []>} : vector<8x512xf32>, vector<512x64xf32>, vector<8x64xf32> -> vector<8x64xf32>
    %c0_3 = arith.constant 0 : index
    %c0_4 = arith.constant 0 : index
    %3 = vector.load %arg3[%c0_3, %c0_4] : memref<1x64xf32, #tpu.memory_space<vmem>>, vector<1x64xf32>
    %4 = vector.broadcast %3 : vector<1x64xf32> to vector<8x64xf32>
    %5 = arith.addf %2, %4 : vector<8x64xf32>
    %cst_5 = arith.constant 0.000000e+00 : f32
    %6 = vector.broadcast %cst_5 : f32 to vector<8x64xf32>
    %7 = arith.cmpf ogt, %5, %6 : vector<8x64xf32>
    %cst_6 = arith.constant 0.00999999977 : f32
    %8 = vector.broadcast %cst_6 : f32 to vector<8x64xf32>
    %9 = arith.mulf %8, %5 : vector<8x64xf32>
    %10 = arith.select %7, %5, %9 : vector<8x64xi1>, vector<8x64xf32>
    %c0_7 = arith.constant 0 : index
    %c0_8 = arith.constant 0 : index
    %11 = vector.load %arg4[%c0_7, %c0_8] : memref<64x32xf32, #tpu.memory_space<vmem>>, vector<64x32xf32>
    %cst_9 = arith.constant dense<0.000000e+00> : vector<8x32xf32>
    %12 = tpu.matmul %10, %11, %cst_9 {dimension_numbers = #tpu.dot_dimension_numbers<[1], [0], [0], [1], [0, 0, 1, 1], [], []>} : vector<8x64xf32>, vector<64x32xf32>, vector<8x32xf32> -> vector<8x32xf32>
    %c0_10 = arith.constant 0 : index
    %c0_11 = arith.constant 0 : index
    %13 = vector.load %arg5[%c0_10, %c0_11] : memref<1x32xf32, #tpu.memory_space<vmem>>, vector<1x32xf32>
    %14 = vector.broadcast %13 : vector<1x32xf32> to vector<8x32xf32>
    %15 = arith.addf %12, %14 : vector<8x32xf32>
    %cst_12 = arith.constant 0.000000e+00 : f32
    %16 = vector.broadcast %cst_12 : f32 to vector<8x32xf32>
    %17 = arith.cmpf ogt, %15, %16 : vector<8x32xf32>
    %cst_13 = arith.constant 0.00999999977 : f32
    %18 = vector.broadcast %cst_13 : f32 to vector<8x32xf32>
    %19 = arith.mulf %18, %15 : vector<8x32xf32>
    %20 = arith.select %17, %15, %19 : vector<8x32xi1>, vector<8x32xf32>
    %c0_14 = arith.constant 0 : index
    %c0_15 = arith.constant 0 : index
    %21 = vector.load %arg6[%c0_14, %c0_15] : memref<32x16xf32, #tpu.memory_space<vmem>>, vector<32x16xf32>
    %cst_16 = arith.constant dense<0.000000e+00> : vector<8x16xf32>
    %22 = tpu.matmul %20, %21, %cst_16 {dimension_numbers = #tpu.dot_dimension_numbers<[1], [0], [0], [1], [0, 0, 1, 1], [], []>} : vector<8x32xf32>, vector<32x16xf32>, vector<8x16xf32> -> vector<8x16xf32>
    %c0_17 = arith.constant 0 : index
    %c0_18 = arith.constant 0 : index
    %23 = vector.load %arg7[%c0_17, %c0_18] : memref<1x16xf32, #tpu.memory_space<vmem>>, vector<1x16xf32>
    %24 = vector.broadcast %23 : vector<1x16xf32> to vector<8x16xf32>
    %25 = arith.addf %22, %24 : vector<8x16xf32>
    %cst_19 = arith.constant 0.000000e+00 : f32
    %26 = vector.broadcast %cst_19 : f32 to vector<8x16xf32>
    %27 = arith.cmpf ogt, %25, %26 : vector<8x16xf32>
    %cst_20 = arith.constant 0.00999999977 : f32
    %28 = vector.broadcast %cst_20 : f32 to vector<8x16xf32>
    %29 = arith.mulf %28, %25 : vector<8x16xf32>
    %30 = arith.select %27, %25, %29 : vector<8x16xi1>, vector<8x16xf32>
    %c0_21 = arith.constant 0 : index
    %c0_22 = arith.constant 0 : index
    %31 = vector.load %arg8[%c0_21, %c0_22] : memref<16x8xf32, #tpu.memory_space<vmem>>, vector<16x8xf32>
    %cst_23 = arith.constant dense<0.000000e+00> : vector<8x8xf32>
    %32 = tpu.matmul %30, %31, %cst_23 {dimension_numbers = #tpu.dot_dimension_numbers<[1], [0], [0], [1], [0, 0, 1, 1], [], []>} : vector<8x16xf32>, vector<16x8xf32>, vector<8x8xf32> -> vector<8x8xf32>
    %c0_24 = arith.constant 0 : index
    %c0_25 = arith.constant 0 : index
    %33 = vector.load %arg9[%c0_24, %c0_25] : memref<1x8xf32, #tpu.memory_space<vmem>>, vector<1x8xf32>
    %34 = vector.broadcast %33 : vector<1x8xf32> to vector<8x8xf32>
    %35 = arith.addf %32, %34 : vector<8x8xf32>
    %cst_26 = arith.constant 0.000000e+00 : f32
    %36 = vector.broadcast %cst_26 : f32 to vector<8x8xf32>
    %37 = arith.cmpf ogt, %35, %36 : vector<8x8xf32>
    %cst_27 = arith.constant 0.00999999977 : f32
    %38 = vector.broadcast %cst_27 : f32 to vector<8x8xf32>
    %39 = arith.mulf %38, %35 : vector<8x8xf32>
    %40 = arith.select %37, %35, %39 : vector<8x8xi1>, vector<8x8xf32>
    %c0_28 = arith.constant 0 : index
    %c0_29 = arith.constant 0 : index
    %41 = vector.load %arg10[%c0_28, %c0_29] : memref<8x4xf32, #tpu.memory_space<vmem>>, vector<8x4xf32>
    %cst_30 = arith.constant dense<0.000000e+00> : vector<8x4xf32>
    %42 = tpu.matmul %40, %41, %cst_30 {dimension_numbers = #tpu.dot_dimension_numbers<[1], [0], [0], [1], [0, 0, 1, 1], [], []>} : vector<8x8xf32>, vector<8x4xf32>, vector<8x4xf32> -> vector<8x4xf32>
    %c0_31 = arith.constant 0 : index
    %c0_32 = arith.constant 0 : index
    %43 = vector.load %arg11[%c0_31, %c0_32] : memref<1x4xf32, #tpu.memory_space<vmem>>, vector<1x4xf32>
    %44 = vector.broadcast %43 : vector<1x4xf32> to vector<8x4xf32>
    %45 = arith.addf %42, %44 : vector<8x4xf32>
    %cst_33 = arith.constant 0.000000e+00 : f32
    %46 = vector.broadcast %cst_33 : f32 to vector<8x4xf32>
    %47 = arith.cmpf ogt, %45, %46 : vector<8x4xf32>
    %cst_34 = arith.constant 0.00999999977 : f32
    %48 = vector.broadcast %cst_34 : f32 to vector<8x4xf32>
    %49 = arith.mulf %48, %45 : vector<8x4xf32>
    %50 = arith.select %47, %45, %49 : vector<8x4xi1>, vector<8x4xf32>
    %c0_35 = arith.constant 0 : index
    %c0_36 = arith.constant 0 : index
    %51 = vector.load %arg12[%c0_35, %c0_36] : memref<4x128xf32, #tpu.memory_space<vmem>>, vector<4x128xf32>
    %cst_37 = arith.constant dense<0.000000e+00> : vector<8x128xf32>
    %52 = tpu.matmul %50, %51, %cst_37 {dimension_numbers = #tpu.dot_dimension_numbers<[1], [0], [0], [1], [0, 0, 1, 1], [], []>} : vector<8x4xf32>, vector<4x128xf32>, vector<8x128xf32> -> vector<8x128xf32>
    %c0_38 = arith.constant 0 : index
    %c0_39 = arith.constant 0 : index
    %53 = vector.load %arg13[%c0_38, %c0_39] : memref<1x128xf32, #tpu.memory_space<vmem>>, vector<1x128xf32>
    %54 = vector.broadcast %53 : vector<1x128xf32> to vector<8x128xf32>
    %55 = arith.addf %52, %54 : vector<8x128xf32>
    %cst_40 = arith.constant 0.000000e+00 : f32
    %56 = vector.broadcast %cst_40 : f32 to vector<8x128xf32>
    %57 = arith.cmpf ogt, %55, %56 : vector<8x128xf32>
    %cst_41 = arith.constant 0.00999999977 : f32
    %58 = vector.broadcast %cst_41 : f32 to vector<8x128xf32>
    %59 = arith.mulf %58, %55 : vector<8x128xf32>
    %60 = arith.select %57, %55, %59 : vector<8x128xi1>, vector<8x128xf32>
    %c0_42 = arith.constant 0 : index
    %c0_43 = arith.constant 0 : index
    %61 = vector.load %arg14[%c0_42, %c0_43] : memref<8x128xf32, #tpu.memory_space<vmem>>, vector<8x128xf32>
    tpu.vector_store %arg14[%c0_42, %c0_43], %60 {strides = array<i32>} : memref<8x128xf32, #tpu.memory_space<vmem>>, vector<8x128xf32>,
    return
  }
  func.func @transform_0(%arg0: i32) -> (i32, i32) {
    %c0_i32 = arith.constant 0 : i32
    %c0_i32_0 = arith.constant 0 : i32
    return %arg0, %c0_i32 : i32, i32
  }
  func.func @transform_1(%arg0: i32) -> (i32, i32) {
    %c0_i32 = arith.constant 0 : i32
    %c0_i32_0 = arith.constant 0 : i32
    %c0_i32_1 = arith.constant 0 : i32
    return %c0_i32, %c0_i32_0 : i32, i32
  }
  func.func @transform_2(%arg0: i32) -> (i32, i32) {
    %c0_i32 = arith.constant 0 : i32
    %c0_i32_0 = arith.constant 0 : i32
    %c0_i32_1 = arith.constant 0 : i32
    return %c0_i32, %c0_i32_0 : i32, i32
  }
  func.func @transform_3(%arg0: i32) -> (i32, i32) {
    %c0_i32 = arith.constant 0 : i32
    %c0_i32_0 = arith.constant 0 : i32
    %c0_i32_1 = arith.constant 0 : i32
    return %c0_i32, %c0_i32_0 : i32, i32
  }
  func.func @transform_4(%arg0: i32) -> (i32, i32) {
    %c0_i32 = arith.constant 0 : i32
    %c0_i32_0 = arith.constant 0 : i32
    %c0_i32_1 = arith.constant 0 : i32
    return %c0_i32, %c0_i32_0 : i32, i32
  }
  func.func @transform_5(%arg0: i32) -> (i32, i32) {
    %c0_i32 = arith.constant 0 : i32
    %c0_i32_0 = arith.constant 0 : i32
    %c0_i32_1 = arith.constant 0 : i32
    return %c0_i32, %c0_i32_0 : i32, i32
  }
  func.func @transform_6(%arg0: i32) -> (i32, i32) {
    %c0_i32 = arith.constant 0 : i32
    %c0_i32_0 = arith.constant 0 : i32
    %c0_i32_1 = arith.constant 0 : i32
    return %c0_i32, %c0_i32_0 : i32, i32
  }
  func.func @transform_7(%arg0: i32) -> (i32, i32) {
    %c0_i32 = arith.constant 0 : i32
    %c0_i32_0 = arith.constant 0 : i32
    %c0_i32_1 = arith.constant 0 : i32
    return %c0_i32, %c0_i32_0 : i32, i32
  }
  func.func @transform_8(%arg0: i32) -> (i32, i32) {
    %c0_i32 = arith.constant 0 : i32
    %c0_i32_0 = arith.constant 0 : i32
    %c0_i32_1 = arith.constant 0 : i32
    return %c0_i32, %c0_i32_0 : i32, i32
  }
  func.func @transform_9(%arg0: i32) -> (i32, i32) {
    %c0_i32 = arith.constant 0 : i32
    %c0_i32_0 = arith.constant 0 : i32
    %c0_i32_1 = arith.constant 0 : i32
    return %c0_i32, %c0_i32_0 : i32, i32
  }
  func.func @transform_10(%arg0: i32) -> (i32, i32) {
    %c0_i32 = arith.constant 0 : i32
    %c0_i32_0 = arith.constant 0 : i32
    %c0_i32_1 = arith.constant 0 : i32
    return %c0_i32, %c0_i32_0 : i32, i32
  }
  func.func @transform_11(%arg0: i32) -> (i32, i32) {
    %c0_i32 = arith.constant 0 : i32
    %c0_i32_0 = arith.constant 0 : i32
    %c0_i32_1 = arith.constant 0 : i32
    return %c0_i32, %c0_i32_0 : i32, i32
  }
  func.func @transform_12(%arg0: i32) -> (i32, i32) {
    %c0_i32 = arith.constant 0 : i32
    %c0_i32_0 = arith.constant 0 : i32
    %c0_i32_1 = arith.constant 0 : i32
    return %c0_i32, %c0_i32_0 : i32, i32
  }
  func.func @transform_13(%arg0: i32) -> (i32, i32) {
    %c0_i32 = arith.constant 0 : i32
    %c0_i32_0 = arith.constant 0 : i32
    return %arg0, %c0_i32 : i32, i32
  }
}

</mosaic_0001>

<bundles_post_ra>
// kernel: tpu_custom_call.1
= control target key start
LH: loop header
LB: loop body
LE: loop exit
PB: predicated region body
PF: predicated region fallthrough
CT: control target
= control target key end

     0   :  { %s1265_s0 = inlined_call_operand.vmem [shape: f32[8,512], index: 0, kind: input, shape index: {}]   ;;  %s1266_s1 = inlined_call_operand.vmem [shape: f32[512,64], index: 1, kind: input, shape index: {}]   ;;  %s1267_s2 = inlined_call_operand.vmem [shape: f32[1,64], index: 2, kind: input, shape index: {}]   ;;  %s1268_s3 = inlined_call_operand.vmem [shape: f32[64,32], index: 3, kind: input, shape index: {}]   ;;  %s1269_s4 = inlined_call_operand.vmem [shape: f32[1,32], index: 4, kind: input, shape index: {}]   ;;  %s1270_s5 = inlined_call_operand.vmem [shape: f32[32,16], index: 5, kind: input, shape index: {}]   ;;  %s1271_s6 = inlined_call_operand.vmem [shape: f32[1,16], index: 6, kind: input, shape index: {}]   ;;  %s1272_s7 = inlined_call_operand.vmem [shape: f32[16,8], index: 7, kind: input, shape index: {}]   ;;  %s1273_s8 = inlined_call_operand.vmem [shape: f32[1,8], index: 8, kind: input, shape index: {}]   ;;  %s1274_s9 = inlined_call_operand.vmem [shape: f32[8,4], index: 9, kind: input, shape index: {}]   ;;  %s1275_s10 = inlined_call_operand.vmem [shape: f32[1,4], index: 10, kind: input, shape index: {}]   ;;  %s1276_s11 = inlined_call_operand.vmem [shape: f32[4,128], index: 11, kind: input, shape index: {}]   ;;  %s1277_s12 = inlined_call_operand.vmem [shape: f32[1,128], index: 12, kind: input, shape index: {}]   ;;  %s1278_s13 = inlined_call_operand.hbm [shape: f32[8,128], index: 13, kind: output, shape index: {}]  }
   0x1   :  { %v80_v0 = vld [vmem:[%s1266_s1 + $0xf8] sm:$0xff]  ;;  %v79_v4 = vld [vmem:[%s1266_s1 + $0xf0] sm:$0xff]  ;;  %v78_v8 = vld [vmem:[%s1266_s1 + $0xe8] sm:$0xff] }
   0x2   :  { %v112_v1 = vld [vmem:[%s1266_s1 + $0x1f8] sm:$0xff]  ;;  %730 = vmatprep.subr.mxu0 %v80_v0  ;;  %v111_v5 = vld [vmem:[%s1266_s1 + $0x1f0] sm:$0xff]  ;;  %v110_v9 = vld [vmem:[%s1266_s1 + $0x1e8] sm:$0xff] }
   0x3   :  { %v64_v2 = vld [vmem:[%s1266_s1 + $0x78] sm:$0xff]  ;;  %765 = vmatprep.subr.mxu1 %v112_v1  ;;  %v63_v6 = vld [vmem:[%s1266_s1 + $0x70] sm:$0xff]  ;;  %v62_v10 = vld [vmem:[%s1266_s1 + $0x68] sm:$0xff] }
   0x4   :  { %v96_v3 = vld [vmem:[%s1266_s1 + $0x178] sm:$0xff]  ;;  %731 = vmatpush3.msra.mxu0 %v64_v2  ;;  %v95_v7 = vld [vmem:[%s1266_s1 + $0x170] sm:$0xff]  ;;  %v94_v11 = vld [vmem:[%s1266_s1 + $0x168] sm:$0xff] }
   0x5   :  { %766 = vmatpush3.msra.mxu1 %v96_v3  ;;  %732 = vmatprep.subr.mxu0 %v79_v4  ;;  %v77_v12 = vld [vmem:[%s1266_s1 + $0xe0] sm:$0xff]  ;;  %v76_v16 = vld [vmem:[%s1266_s1 + $0xd8] sm:$0xff]  ;;  %v75_v20 = vld [vmem:[%s1266_s1 + $0xd0] sm:$0xff] }
   0x6   :  { %767 = vmatprep.subr.mxu1 %v111_v5  ;;  %733 = vmatpush3.msra.mxu0 %v63_v6  ;;  %v109_v13 = vld [vmem:[%s1266_s1 + $0x1e0] sm:$0xff]  ;;  %v108_v17 = vld [vmem:[%s1266_s1 + $0x1d8] sm:$0xff]  ;;  %v107_v21 = vld [vmem:[%s1266_s1 + $0x1d0] sm:$0xff] }
   0x7   :  { %768 = vmatpush3.msra.mxu1 %v95_v7  ;;  %734 = vmatprep.subr.mxu0 %v78_v8  ;;  %v61_v14 = vld [vmem:[%s1266_s1 + $0x60] sm:$0xff]  ;;  %v60_v18 = vld [vmem:[%s1266_s1 + $0x58] sm:$0xff]  ;;  %v59_v22 = vld [vmem:[%s1266_s1 + $0x50] sm:$0xff] }
   0x8   :  { %769 = vmatprep.subr.mxu1 %v110_v9  ;;  %v93_v15 = vld [vmem:[%s1266_s1 + $0x160] sm:$0xff]  ;;  %735 = vmatpush3.msra.mxu0 %v62_v10  ;;  %v92_v19 = vld [vmem:[%s1266_s1 + $0x158] sm:$0xff]  ;;  %v91_v23 = vld [vmem:[%s1266_s1 + $0x150] sm:$0xff] }
   0x9   :  { %770 = vmatpush3.msra.mxu1 %v94_v11  ;;  %736 = vmatprep.subr.mxu0 %v77_v12  ;;  %v74_v24 = vld [vmem:[%s1266_s1 + $0xc8] sm:$0xff]  ;;  %v73_v28 = vld [vmem:[%s1266_s1 + $0xc0] sm:$0xff]  ;;  %v72_v32 = vld [vmem:[%s1266_s1 + $0xb8] sm:$0xff] }
   0xa   :  { %771 = vmatprep.subr.mxu1 %v109_v13  ;;  %737 = vmatpush3.msra.mxu0 %v61_v14  ;;  %v106_v25 = vld [vmem:[%s1266_s1 + $0x1c8] sm:$0xff]  ;;  %v105_v29 = vld [vmem:[%s1266_s1 + $0x1c0] sm:$0xff]  ;;  %v104_v33 = vld [vmem:[%s1266_s1 + $0x1b8] sm:$0xff] }
   0xb   :  { %772 = vmatpush3.msra.mxu1 %v93_v15  ;;  %738 = vmatprep.subr.mxu0 %v76_v16  ;;  %v58_v26 = vld [vmem:[%s1266_s1 + $0x48] sm:$0xff]  ;;  %v57_v30 = vld [vmem:[%s1266_s1 + $0x40] sm:$0xff]  ;;  %v56_v34 = vld [vmem:[%s1266_s1 + $0x38] sm:$0xff] }
   0xc   :  { %773 = vmatprep.subr.mxu1 %v108_v17  ;;  %739 = vmatpush3.msra.mxu0 %v60_v18  ;;  %v90_v27 = vld [vmem:[%s1266_s1 + $0x148] sm:$0xff]  ;;  %v89_v31 = vld [vmem:[%s1266_s1 + $0x140] sm:$0xff]  ;;  %v88_v35 = vld [vmem:[%s1266_s1 + $0x138] sm:$0xff] }
   0xd   :  { %774 = vmatpush3.msra.mxu1 %v92_v19  ;;  %740 = vmatprep.subr.mxu0 %v75_v20  ;;  %v71_v36 = vld [vmem:[%s1266_s1 + $0xb0] sm:$0xff]  ;;  %v70_v40 = vld [vmem:[%s1266_s1 + $0xa8] sm:$0xff]  ;;  %v69_v44 = vld [vmem:[%s1266_s1 + $0xa0] sm:$0xff] }
   0xe   :  { %775 = vmatprep.subr.mxu1 %v107_v21  ;;  %741 = vmatpush3.msra.mxu0 %v59_v22  ;;  %v103_v37 = vld [vmem:[%s1266_s1 + $0x1b0] sm:$0xff]  ;;  %v102_v41 = vld [vmem:[%s1266_s1 + $0x1a8] sm:$0xff]  ;;  %v101_v45 = vld [vmem:[%s1266_s1 + $0x1a0] sm:$0xff] }
   0xf   :  { %776 = vmatpush3.msra.mxu1 %v91_v23  ;;  %742 = vmatprep.subr.mxu0 %v74_v24  ;;  %v55_v38 = vld [vmem:[%s1266_s1 + $0x30] sm:$0xff]  ;;  %v54_v42 = vld [vmem:[%s1266_s1 + $0x28] sm:$0xff]  ;;  %v53_v46 = vld [vmem:[%s1266_s1 + $0x20] sm:$0xff] }
  0x10   :  { %777 = vmatprep.subr.mxu1 %v106_v25  ;;  %743 = vmatpush3.msra.mxu0 %v58_v26  ;;  %v87_v39 = vld [vmem:[%s1266_s1 + $0x130] sm:$0xff]  ;;  %v86_v43 = vld [vmem:[%s1266_s1 + $0x128] sm:$0xff]  ;;  %v85_v47 = vld [vmem:[%s1266_s1 + $0x120] sm:$0xff] }
  0x11   :  { %778 = vmatpush3.msra.mxu1 %v90_v27  ;;  %744 = vmatprep.subr.mxu0 %v73_v28  ;;  %v68_v48 = vld [vmem:[%s1266_s1 + $0x98] sm:$0xff] }
  0x12   :  { %779 = vmatprep.subr.mxu1 %v105_v29  ;;  %745 = vmatpush3.msra.mxu0 %v57_v30  ;;  %v100_v49 = vld [vmem:[%s1266_s1 + $0x198] sm:$0xff] }
  0x13   :  { %780 = vmatpush3.msra.mxu1 %v89_v31  ;;  %746 = vmatprep.subr.mxu0 %v72_v32  ;;  %v52_v50 = vld [vmem:[%s1266_s1 + $0x18] sm:$0xff] }
  0x14   :  { %781 = vmatprep.subr.mxu1 %v104_v33  ;;  %747 = vmatpush3.msra.mxu0 %v56_v34  ;;  %v84_v51 = vld [vmem:[%s1266_s1 + $0x118] sm:$0xff] }
  0x15   :  { %782 = vmatpush3.msra.mxu1 %v88_v35  ;;  %748 = vmatprep.subr.mxu0 %v71_v36 }
  0x16   :  { %783 = vmatprep.subr.mxu1 %v103_v37  ;;  %749 = vmatpush3.msra.mxu0 %v55_v38 }
  0x17   :  { %784 = vmatpush3.msra.mxu1 %v87_v39  ;;  %750 = vmatprep.subr.mxu0 %v70_v40 }
  0x18   :  { %785 = vmatprep.subr.mxu1 %v102_v41  ;;  %751 = vmatpush3.msra.mxu0 %v54_v42 }
  0x19   :  { %786 = vmatpush3.msra.mxu1 %v86_v43  ;;  %752 = vmatprep.subr.mxu0 %v69_v44 }
  0x1a   :  { %787 = vmatprep.subr.mxu1 %v101_v45 }
  0x1b   :  { %18 = vsyncpa [#allocation3], 0  ;;  %753 = vmatpush3.msra.mxu0 %v53_v46  ;;  %788 = vmatpush3.msra.mxu1 %v85_v47  ;;  %v67_v52 = vld [vmem:[%s1266_s1 + $0x90] sm:$0xff]  ;;  %v66_v56 = vld [vmem:[%s1266_s1 + $0x88] sm:$0xff]  ;;  %v893_v5 = vmov 0.0   ;;  %vm894_vm0 = vmmov 0  }
  0x1c   :  { %v99_v53 = vld [vmem:[%s1266_s1 + $0x190] sm:$0xff]  ;;  %754 = vmatprep.subr.mxu0 %v68_v48  ;;  %789 = vmatprep.subr.mxu1 %v100_v49  ;;  %v98_v57 = vld [vmem:[%s1266_s1 + $0x188] sm:$0xff]  ;;  %v65_v60 = vld [vmem:[%s1266_s1 + $0x80] sm:$0xff]  ;;  %vm278_vm2 = vcmask 523264   ;;  %vm366_vm4 = vcmask 261120   ;;  %vm452_vm6 = vcmask 130048  }
  0x1d   :  { %v51_v54 = vld [vmem:[%s1266_s1 + $0x10] sm:$0xff]  ;;  %755 = vmatpush3.msra.mxu0 %v52_v50  ;;  %790 = vmatpush3.msra.mxu1 %v84_v51  ;;  %v50_v58 = vld [vmem:[%s1266_s1 + $0x8] sm:$0xff]  ;;  %v97_v61 = vld [vmem:[%s1266_s1 + $0x180] sm:$0xff]  ;;  %vm537_vm8 = vcmask 64512   ;;  %vm626_vm9 = vcmask 1043456   ;;  %vm622_vm11 = vcmask 31744  }
  0x1e   :  { %v83_v55 = vld [vmem:[%s1266_s1 + $0x110] sm:$0xff]  ;;  %756 = vmatprep.subr.mxu0 %v67_v52  ;;  %791 = vmatprep.subr.mxu1 %v99_v53  ;;  %v82_v59 = vld [vmem:[%s1266_s1 + $0x108] sm:$0xff]  ;;  %v49_v62 = vld [vmem:[%s1266_s1] sm:$0xff] }
  0x1f   :  { %757 = vmatpush3.msra.mxu0 %v51_v54  ;;  %792 = vmatpush3.msra.mxu1 %v83_v55  ;;  %v46_v63 = vld [vmem:[%s1265_s0 + $0x8] sm:$0xff]  ;;  %v81_v0 = vld [vmem:[%s1266_s1 + $0x100] sm:$0xff]  ;;  %v48_v1 = vld [vmem:[%s1265_s0 + $0x18] sm:$0xff] }
  0x20   :  { %758 = vmatprep.subr.mxu0 %v66_v56  ;;  %793 = vmatprep.subr.mxu1 %v98_v57  ;;  %v45_v2 = vld [vmem:[%s1265_s0] sm:$0xff]  ;;  %v47_v3 = vld [vmem:[%s1265_s0 + $0x10] sm:$0xff]  ;;  %v270_v4 = vld [vmem:[%s1268_s3 + $0x38] sm:$0xff] }
  0x21   :  { %759 = vmatpush3.msra.mxu0 %v50_v58  ;;  %794 = vmatpush3.msra.mxu1 %v82_v59  ;;  %v269_v6 = vld [vmem:[%s1268_s3 + $0x30] sm:$0xff]  ;;  %v268_v7 = vld [vmem:[%s1268_s3 + $0x28] sm:$0xff]  ;;  %v267_v8 = vld [vmem:[%s1268_s3 + $0x20] sm:$0xff] }
  0x22   :  { %760 = vmatprep.subr.mxu0 %v65_v60  ;;  %795 = vmatprep.subr.mxu1 %v97_v61  ;;  %v266_v9 = vld [vmem:[%s1268_s3 + $0x18] sm:$0xff]  ;;  %v265_v10 = vld [vmem:[%s1268_s3 + $0x10] sm:$0xff]  ;;  %v264_v11 = vld [vmem:[%s1268_s3 + $0x8] sm:$0xff] }
  0x23   :  { %761 = vmatpush3.msra.mxu0 %v49_v62  ;;  %184 = vmatprep.mubr.f32.mxu0 %v46_v63  ;;  %v263_v12 = vld [vmem:[%s1268_s3] sm:$0xff]  ;;  %v358_v13 = vld [vmem:[%s1270_s5 + $0x18] sm:$0xff]  ;;  %v357_v25 = vld [vmem:[%s1270_s5 + $0x10] sm:$0xff] }
  0x24   :  { %796 = vmatpush3.msra.mxu1 %v81_v0  ;;  %254 = vmatprep.mubr.f32.mxu1 %v48_v1  ;;  %v718_v16 = vld [vmem:[%s1267_s2] ss:$0 sm:$0xff]  ;;  %v356_v26 = vld [vmem:[%s1270_s5 + $0x8] sm:$0xff] }
  0x25   :  { %185 = vmatmul.mubr.f32.vlgmr.msra.gmra.mxu0 %v45_v2  ;;  %255 = vmatmul.mubr.f32.vlgmr.msra.gmra.mxu1 %v47_v3  ;;  %v355_v27 = vld [vmem:[%s1270_s5] sm:$0xff]  ;;  %v444_v34 = vld [vmem:[%s1272_s7 + $0x8] sm:$0xff] }
  0x26   :  { %821 = vmatprep.subr.mxu0 %v893_v5  ;;  %840 = vmatprep.subr.mxu1 %v893_v5  ;;  %v719_v28 = vld [vmem:[%s1269_s4] ss:$0 sm:$0xff] }
  0x27   :  { %822 = vmatpush3.msra.mxu0 %v270_v4  ;;  %837 = vmatprep.mubr.msk.f32.mxu0 %vm894_vm0, %v893_v5  ;;  %v443_v35 = vld [vmem:[%s1272_s7] sm:$0xff] }
  0x28   :  { %823 = vmatprep.subr.mxu0 %v893_v5  ;;  %848 = vmatprep.mubr.msk.f32.mxu1 %vm894_vm0, %v893_v5  ;;  %v721_v36 = vld [vmem:[%s1271_s6] ss:$0 sm:$0xff] }
  0x29   :  { %824 = vmatpush3.msra.mxu0 %v269_v6  ;;  %841 = vmatpush3.msra.mxu1 %v358_v13  ;;  %v529_v42 = vld [vmem:[%s1274_s9] sm:$0xff] }
  0x2a   :  { %825 = vmatprep.subr.mxu0 %v893_v5  ;;  %842 = vmatprep.subr.mxu1 %v893_v5  ;;  %v723_v43 = vld [vmem:[%s1273_s8] ss:$0 sm:$0xff] }
  0x2b   :  { %826 = vmatpush3.msra.mxu0 %v268_v7  ;;  %843 = vmatpush3.msra.mxu1 %v357_v25  ;;  %v614_v49 = vld [vmem:[%s1276_s11] sm:$0xf]  ;;  %s895_s11 = smov [#allocation2]  }
  0x2c   :  { %827 = vmatprep.subr.mxu0 %v893_v5  ;;  %844 = vmatprep.subr.mxu1 %v893_v5  ;;  %v725_v50 = vld [vmem:[%s1275_s10] ss:$0 sm:$0xff]  ;;  %s710_s23 = sshll.u32 %s895_s11, 4  ;;  %s711_s23 = int_to_ptr.vmem [resolvable:$true] %s710_s23 }
  0x2d   :  { %828 = vmatpush3.msra.mxu0 %v267_v8  ;;  %845 = vmatpush3.msra.mxu1 %v356_v26  ;;  %v727_v56 = vld [vmem:[%s1277_s12] ss:$0 sm:$0xff]  ;;  %s871_s10 = scalar_lea.vmem %s711_s23, 128  ;;  %p876_p1 = scmp.lt.s32.totalorder %s711_s23, %s711_s23 }
  0x2e   :  { %829 = vmatprep.subr.mxu0 %v893_v5  ;;  %846 = vmatprep.subr.mxu1 %v893_v5  ;;  %p872_p0 = scmp.ne.s32.totalorder %s711_s23, %s871_s10  ;;  %p877_p2 = scmp.lt.s32.totalorder %s871_s10, %s871_s10 }
  0x2f   :  { %830 = vmatpush3.msra.mxu0 %v266_v9  ;;  %847 = vmatpush3.msra.mxu1 %v355_v27 }
  0x30   :  { %831 = vmatprep.subr.mxu0 %v893_v5  ;;  %851 = vmatprep.subr.mxu1 %v893_v5  ;;  %p878_p3 = por %p877_p2, %p876_p1 }
  0x31   :  { %832 = vmatpush3.msra.mxu0 %v265_v10 }
  0x32   :  { %833 = vmatprep.subr.mxu0 %v893_v5  ;;  %p879_p4 = pnand %p878_p3, %p872_p0 }
  0x33   :  { %834 = vmatpush3.msra.mxu0 %v264_v11 }
  0x34   :  { %835 = vmatprep.subr.mxu0 %v893_v5 }
  0x35   :  { %836 = vmatpush3.msra.mxu0 %v263_v12 }
  0x36   :  { %863 = vmatprep.subr.mxu0 %v893_v5 }
  0xe5   :  { %v762_v14 = vpop.f32.mrf.mxu0  ;;  %v797_v15 = vpop.f32.mrf.mxu1 }
  0xe7   :  { %v763_v17 = vpop.f32.mrf.mxu0  ;;  %v798_v18 = vpop.f32.mrf.mxu1 }
  0xe8   :  { %v764_v19 = vadd.f32 %v763_v17, %v762_v14  ;;  %v799_v21 = vadd.f32 %v798_v18, %v797_v15 }
  0xea   :  { %v187_v20 = vadd.f32 %v764_v19, %v718_v16 }
  0xec   :  { %v257_v22 = vadd.f32 %v799_v21, %v187_v20 }
  0xee   :  { %vm260_vm1 = vcmp.gt.f32.partialorder %v257_v22, 0.0  ;;  %v261_v23 = vmul.f32 0.01, %v257_v22 }
  0xf0   :  { %v262_v24 = vsel %vm260_vm1, %v257_v22, %v261_v23 }
  0xf1   :  { %838 = vmatmul.mubr.msk.f32.vlgmr.msra.gmra.mxu0 %vm278_vm2, %v262_v24 }
  0xf2   :  { %865 = vmatprep.mubr.msk.f32.mxu0 %vm894_vm0, %v893_v5  ;;  %864 = vmatpush3.msk.msra.mxu0 %vm626_vm9, %v614_v49 }
 0x1b1   :  { %v348_v29 = vpop.f32.mrf.mxu0 }
 0x1b2   :  { %v349_v30 = vadd.f32 %v719_v28, %v348_v29 }
 0x1b3   :  { %v839_v31 = vpop.f32.mrf.mxu0 }
 0x1b4   :  { %vm352_vm3 = vcmp.gt.f32.partialorder %v349_v30, 0.0  ;;  %v353_v32 = vmul.f32 0.01, %v349_v30 }
 0x1b6   :  { %v354_v33 = vsel %vm352_vm3, %v349_v30, %v353_v32 }
 0x1b7   :  { %849 = vmatmul.mubr.msk.f32.vlgmr.msra.gmra.mxu1 %vm366_vm4, %v354_v33 }
 0x1b8   :  { %855 = vmatprep.mubr.msk.f32.mxu1 %vm894_vm0, %v893_v5  ;;  %852 = vmatpush3.msra.mxu1 %v444_v34 }
 0x1b9   :  { %853 = vmatprep.subr.mxu1 %v893_v5 }
 0x1ba   :  { %854 = vmatpush3.msra.mxu1 %v443_v35 }
 0x1bb   :  { %858 = vmatprep.subr.mxu1 %v893_v5 }
 0x277   :  { %v436_v37 = vpop.f32.mrf.mxu1 }
 0x278   :  { %v437_v38 = vadd.f32 %v721_v36, %v436_v37 }
 0x279   :  { %v850_v39 = vpop.f32.mrf.mxu1 }
 0x27a   :  { %vm440_vm5 = vcmp.gt.f32.partialorder %v437_v38, 0.0  ;;  %v441_v40 = vmul.f32 0.01, %v437_v38 }
 0x27c   :  { %v442_v41 = vsel %vm440_vm5, %v437_v38, %v441_v40 }
 0x27d   :  { %856 = vmatmul.mubr.msk.f32.vlgmr.msra.gmra.mxu1 %vm452_vm6, %v442_v41 }
 0x27e   :  { %860 = vmatprep.mubr.msk.f32.mxu1 %vm894_vm0, %v893_v5  ;;  %859 = vmatpush3.msra.mxu1 %v529_v42 }
 0x33d   :  { %v522_v44 = vpop.f32.mrf.mxu1 }
 0x33e   :  { %v523_v45 = vadd.f32 %v723_v43, %v522_v44 }
 0x33f   :  { %v857_v46 = vpop.f32.mrf.mxu1 }
 0x340   :  { %vm526_vm7 = vcmp.gt.f32.partialorder %v523_v45, 0.0  ;;  %v527_v47 = vmul.f32 0.01, %v523_v45 }
 0x342   :  { %v528_v48 = vsel %vm526_vm7, %v523_v45, %v527_v47 }
 0x343   :  { %861 = vmatmul.mubr.msk.f32.vlgmr.msra.gmra.mxu1 %vm537_vm8, %v528_v48 }
 0x403   :  { %v607_v51 = vpop.f32.mrf.mxu1 }
 0x404   :  { %v608_v52 = vadd.f32 %v725_v50, %v607_v51 }
 0x405   :  { %v862_v53 = vpop.f32.mrf.mxu1 }
 0x406   :  { %vm611_vm10 = vcmp.gt.f32.partialorder %v608_v52, 0.0  ;;  %v612_v54 = vmul.f32 0.01, %v608_v52 }
 0x408   :  { %v613_v55 = vsel %vm611_vm10, %v608_v52, %v612_v54 }
 0x409   :  { %866 = vmatmul.mubr.msk.f32.vlgmr.msra.gmra.mxu0 %vm622_vm11, %v613_v55 }
 0x4c9   :  { %v696_v57 = vpop.f32.mrf.mxu0 }
 0x4ca   :  { %v697_v58 = vadd.f32 %v727_v56, %v696_v57 }
 0x4cb   :  { %v867_v59 = vpop.f32.mrf.mxu0 }
 0x4cc   :  { %v701_v60 = vmul.f32 0.01, %v697_v58  ;;  %vm700_vm12 = vcmp.gt.f32.partialorder %v697_v58, 0.0 }
 0x4ce   :  { %v702_v61 = vsel %vm700_vm12, %v697_v58, %v701_v60 }
 0x4cf   :  { %703 = vst [vmem:[#allocation2] sm:$0xff] %v702_v61 }
 0x4d0   :  { %882 = shalt.err (!%p879_p4)
}
 0x4d1   :  { %713 = dma.vmem_to_hbm [thread:$0]  %s711_s23, 128, %s1278_s13, [#allocation3]  }
 0x4d2   :  { %891 = dma.done.wait [#allocation3], 128  }
 0x4d3   :  { %892 = vsyncadd [#allocation3], 4294967168 }
 0x4d4   :  { %717 = vsyncpa [#allocation3], 1 }

</bundles_post_ra>
